<compile_context>
chip_gen: v7x
topology: tpu7x:2x2x1
jax: 0.10.0
libtpu: 0.0.40
codegen_flags: <defaults>
</compile_context>

<pallas_src>
import functools

import jax
import jax.numpy as jnp
from jax.experimental import pallas as pl
from jax.experimental.pallas import tpu as pltpu

_HIDDEN = 512
_LANE = 128


def _round_up(x, m):
    return (x + m - 1) // m * m


def _cdiv(a, b):
    return -(-a // b)


def _detect_bf16_eup():
    """True on TPU generations whose VPU/EUP support bf16 (v6e, v7x)."""
    try:
        kind = jax.devices()[0].device_kind.lower()
    except Exception:
        return False
    return ("v6" in kind) or ("v7" in kind) or ("7x" in kind)


_BF16_EUP = _detect_bf16_eup()


def _actor_kernel(x_ref, w1_ref, b1_ref, w2_ref, b2_ref, w3_ref, b3_ref, o_ref,
                  *, bf16_act):
    """Fused 3-layer MLP: Tanh(SiLU(SiLU(x@W1+b1)@W2+b2)@W3+b3).

    Matmuls accumulate in f32 (preferred_element_type).  SiLU uses a single
    EUP op per element (tanh form) and runs in bf16 on v6e/v7x, f32 on v5e.
    The final tanh is always f32.
    """
    act_dtype = jnp.bfloat16 if bf16_act else jnp.float32

    def silu(h):
        # h * sigmoid(h) == 0.5*h*(1 + tanh(0.5*h)):
        # one EUP op (tanh) per element instead of exp + reciprocal.
        h = h.astype(act_dtype)
        return 0.5 * h * (1.0 + jnp.tanh(0.5 * h))

    # Layer 1 stays f32 end-to-end (tiny K=state_size matmul, ~1% of FLOPs).
    h1 = jnp.dot(x_ref[...], w1_ref[...],
                 preferred_element_type=jnp.float32) + b1_ref[...]
    h1 = silu(h1).astype(jnp.bfloat16)                               # SiLU

    h2 = jnp.dot(h1, w2_ref[...],
                 preferred_element_type=jnp.float32) + b2_ref[...]
    h2 = silu(h2).astype(jnp.bfloat16)                               # SiLU

    h3 = jnp.dot(h2, w3_ref[...],
                 preferred_element_type=jnp.float32) + b3_ref[...]
    o_ref[...] = jnp.tanh(h3).astype(o_ref.dtype)                    # Tanh (f32)


def _choose_block_b(B, cap=512):
    """Batch tile: minimize zero-padding; >=2 tiles when B > 128 (v7x 2 TCs)."""
    if B <= 128:
        return _round_up(max(B, 1), 8)
    tiles = max(2, _cdiv(B, cap))
    return _round_up(_cdiv(B, tiles), 8)


@functools.partial(jax.jit, static_argnames=("block_b", "bf16_act"))
def actor_forward(x, params, *, block_b=None, bf16_act=_BF16_EUP):
    """Fused actor MLP forward. x: [B, state_size] f32 -> [B, action_size] f32."""
    w1, b1, w2, b2, w3, b3 = params
    B, S = x.shape
    H = w1.shape[1]
    A = w3.shape[1]

    if block_b is None:
        block_b = _choose_block_b(B)
    Bp = _round_up(B, block_b)

    # W1 stays f32 (layer-1 accuracy, negligible cost).  W2/W3 bf16: MXU-native
    # rate + half the HBM traffic on the dominant 512x512 fetch.
    w2b = w2.astype(jnp.bfloat16)

    # Lane-pad the last layer to a multiple of 128 outputs -> lane-dense stores.
    Ap = _round_up(A, _LANE)
    w3p = jnp.zeros((H, Ap), jnp.bfloat16).at[:, :A].set(w3.astype(jnp.bfloat16))
    b3p = jnp.zeros((1, Ap), jnp.float32).at[:, :A].set(b3)

    # Zero-pad batch to the tile (padded rows discarded at the end).
    x_pad = x if Bp == B else jnp.pad(x, ((0, Bp - B), (0, 0)))

    grid = (Bp // block_b,)

    # Advisory cost hint for XLA's scheduler around the custom call.
    flops = 2 * Bp * (S * H + H * H + H * Ap)
    transcendentals = Bp * (2 * H + Ap)          # one tanh per SiLU elem + final tanh
    bytes_accessed = (x_pad.size * x_pad.dtype.itemsize
                      + w1.size * 4 + (w2b.size + w3p.size) * 2
                      + (b1.size + b2.size + b3p.size) * 4
                      + Bp * Ap * 4)

    kernel = functools.partial(_actor_kernel, bf16_act=bf16_act)

    out = pl.pallas_call(
        kernel,
        out_shape=jax.ShapeDtypeStruct((Bp, Ap), jnp.float32),
        grid_spec=pl.GridSpec(
            grid=grid,
            in_specs=[
                pl.BlockSpec((block_b, S), lambda i: (i, 0)),    # x tile
                # Constant index_maps -> weights/biases fetched once, resident
                # in VMEM across all batch tiles.
                pl.BlockSpec((S, H), lambda i: (0, 0)),          # W1 (f32)
                pl.BlockSpec((1, H), lambda i: (0, 0)),          # b1
                pl.BlockSpec((H, H), lambda i: (0, 0)),          # W2 (bf16)
                pl.BlockSpec((1, H), lambda i: (0, 0)),          # b2
                pl.BlockSpec((H, Ap), lambda i: (0, 0)),         # W3 (bf16, lane-padded)
                pl.BlockSpec((1, Ap), lambda i: (0, 0)),         # b3 (lane-padded)
            ],
            out_specs=pl.BlockSpec((block_b, Ap), lambda i: (i, 0)),
        ),
        compiler_params=pltpu.CompilerParams(
            dimension_semantics=("parallel",),
        ),
        cost_estimate=pl.CostEstimate(
            flops=flops,
            transcendentals=transcendentals,
            bytes_accessed=bytes_accessed,
        ),
    )(x_pad, w1, b1, w2b, b2, w3p, b3p)

    return out[:B, :A]


def init_actor_params(key, state_size, action_size, hidden=_HIDDEN):
    """Deterministic init mimicking torch.nn.Linear default (U[-1/sqrt(fan_in), +])."""
    dims = [(state_size, hidden), (hidden, hidden), (hidden, action_size)]
    params = []
    for fan_in, fan_out in dims:
        kw, kb, key = jax.random.split(key, 3)
        bound = 1.0 / jnp.sqrt(jnp.float32(fan_in))
        w = jax.random.uniform(kw, (fan_in, fan_out), jnp.float32, -bound, bound)
        b = jax.random.uniform(kb, (1, fan_out), jnp.float32, -bound, bound)
        params += [w, b]
    return tuple(params)


def actor_reference(x, params):
    """Pure-JAX f32 reference of the PyTorch forward, for correctness checking."""
    w1, b1, w2, b2, w3, b3 = params
    h = x @ w1 + b1
    h = h * jax.nn.sigmoid(h)
    h = h @ w2 + b2
    h = h * jax.nn.sigmoid(h)
    return jnp.tanh(h @ w3 + b3)


if __name__ == "__main__":
    key = jax.random.PRNGKey(0)
    state_size, action_size = 16, 4

    kx, kp, kx2 = jax.random.split(key, 3)
    params = init_actor_params(kp, state_size, action_size)

    # Tiny batch (DDPG action selection): single full-array block, grid=(1,).
    x_small = jax.random.normal(kx, (8, state_size), jnp.float32)
    out_small = jax.block_until_ready(actor_forward(x_small, params))
    ref_small = actor_reference(x_small, params)
    assert out_small.shape == (8, action_size)
    # bf16 W2/W3 (and bf16 SiLU on v6e/v7x) -> loosened tolerance vs f32 reference.
    assert jnp.allclose(out_small, ref_small, atol=2e-2, rtol=2e-2)

    # Larger, non-tile-divisible batch: exercises min-pad tiling (2 x 152 rows),
    # a 2-step parallel grid (both v7x TensorCores), and zero-row padding.
    x_big = jax.random.normal(kx2, (300, state_size), jnp.float32)
    out_big = jax.block_until_ready(actor_forward(x_big, params))
    ref_big = actor_reference(x_big, params)
    assert out_big.shape == (300, action_size)
    assert jnp.allclose(out_big, ref_big, atol=2e-2, rtol=2e-2)

    print("KERNEL_OK")
</pallas_src>

<mosaic_0001>
module attributes {stable_mosaic.version = 11 : i64} {
  func.func @_actor_kernel(%arg0: i32, %arg1: memref<8x16xf32, #tpu.memory_space<vmem>>, %arg2: memref<16x512xf32, #tpu.memory_space<vmem>>, %arg3: memref<1x512xf32, #tpu.memory_space<vmem>>, %arg4: memref<512x512xbf16, #tpu.memory_space<vmem>>, %arg5: memref<1x512xf32, #tpu.memory_space<vmem>>, %arg6: memref<512x128xbf16, #tpu.memory_space<vmem>>, %arg7: memref<1x128xf32, #tpu.memory_space<vmem>>, %arg8: memref<8x128xf32, #tpu.memory_space<vmem>>) attributes {dimension_semantics = [#tpu.dimension_semantics<parallel>], iteration_bounds = array<i64: 1>, scalar_prefetch = 0 : i64, scratch_operands = 0 : i64, tpu.core_type = #tpu.core_type<tc>, window_params = [{transform_indices = @transform_0, window_bounds = array<i64: 8, 16>}, {pipeline_mode = #tpu.pipeline_mode<synchronous>, transform_indices = @transform_1, window_bounds = array<i64: 16, 512>}, {pipeline_mode = #tpu.pipeline_mode<synchronous>, transform_indices = @transform_2, window_bounds = array<i64: 1, 512>}, {pipeline_mode = #tpu.pipeline_mode<synchronous>, transform_indices = @transform_3, window_bounds = array<i64: 512, 512>}, {pipeline_mode = #tpu.pipeline_mode<synchronous>, transform_indices = @transform_4, window_bounds = array<i64: 1, 512>}, {pipeline_mode = #tpu.pipeline_mode<synchronous>, transform_indices = @transform_5, window_bounds = array<i64: 512, 128>}, {pipeline_mode = #tpu.pipeline_mode<synchronous>, transform_indices = @transform_6, window_bounds = array<i64: 1, 128>}, {transform_indices = @transform_7, window_bounds = array<i64: 8, 128>}]} {
    %c0 = arith.constant 0 : index
    %c0_0 = arith.constant 0 : index
    %0 = vector.load %arg1[%c0, %c0_0] : memref<8x16xf32, #tpu.memory_space<vmem>>, vector<8x16xf32>
    %c0_1 = arith.constant 0 : index
    %c0_2 = arith.constant 0 : index
    %1 = vector.load %arg2[%c0_1, %c0_2] : memref<16x512xf32, #tpu.memory_space<vmem>>, vector<16x512xf32>
    %cst = arith.constant dense<0.000000e+00> : vector<8x512xf32>
    %2 = tpu.matmul %0, %1, %cst {dimension_numbers = #tpu.dot_dimension_numbers<[1], [0], [0], [1], [0, 0, 1, 1], [], []>} : vector<8x16xf32>, vector<16x512xf32>, vector<8x512xf32> -> vector<8x512xf32>
    %c0_3 = arith.constant 0 : index
    %c0_4 = arith.constant 0 : index
    %3 = vector.load %arg3[%c0_3, %c0_4] : memref<1x512xf32, #tpu.memory_space<vmem>>, vector<1x512xf32>
    %4 = vector.broadcast %3 : vector<1x512xf32> to vector<8x512xf32>
    %5 = arith.addf %2, %4 : vector<8x512xf32>
    %cst_5 = arith.constant 5.000000e-01 : f32
    %6 = vector.broadcast %cst_5 : f32 to vector<8x512xf32>
    %7 = arith.mulf %6, %5 : vector<8x512xf32>
    %cst_6 = arith.constant 5.000000e-01 : f32
    %8 = vector.broadcast %cst_6 : f32 to vector<8x512xf32>
    %9 = arith.mulf %8, %5 : vector<8x512xf32>
    %10 = math.tanh %9 : vector<8x512xf32>
    %cst_7 = arith.constant 1.000000e+00 : f32
    %11 = vector.broadcast %cst_7 : f32 to vector<8x512xf32>
    %12 = arith.addf %11, %10 : vector<8x512xf32>
    %13 = arith.mulf %7, %12 : vector<8x512xf32>
    %14 = arith.truncf %13 : vector<8x512xf32> to vector<8x512xbf16>
    %c0_8 = arith.constant 0 : index
    %c0_9 = arith.constant 0 : index
    %15 = vector.load %arg4[%c0_8, %c0_9] : memref<512x512xbf16, #tpu.memory_space<vmem>>, vector<512x512xbf16>
    %cst_10 = arith.constant dense<0.000000e+00> : vector<8x512xf32>
    %16 = tpu.matmul %14, %15, %cst_10 {dimension_numbers = #tpu.dot_dimension_numbers<[1], [0], [0], [1], [0, 0, 1, 1], [], []>} : vector<8x512xbf16>, vector<512x512xbf16>, vector<8x512xf32> -> vector<8x512xf32>
    %c0_11 = arith.constant 0 : index
    %c0_12 = arith.constant 0 : index
    %17 = vector.load %arg5[%c0_11, %c0_12] : memref<1x512xf32, #tpu.memory_space<vmem>>, vector<1x512xf32>
    %18 = vector.broadcast %17 : vector<1x512xf32> to vector<8x512xf32>
    %19 = arith.addf %16, %18 : vector<8x512xf32>
    %cst_13 = arith.constant 5.000000e-01 : f32
    %20 = vector.broadcast %cst_13 : f32 to vector<8x512xf32>
    %21 = arith.mulf %20, %19 : vector<8x512xf32>
    %cst_14 = arith.constant 5.000000e-01 : f32
    %22 = vector.broadcast %cst_14 : f32 to vector<8x512xf32>
    %23 = arith.mulf %22, %19 : vector<8x512xf32>
    %24 = math.tanh %23 : vector<8x512xf32>
    %cst_15 = arith.constant 1.000000e+00 : f32
    %25 = vector.broadcast %cst_15 : f32 to vector<8x512xf32>
    %26 = arith.addf %25, %24 : vector<8x512xf32>
    %27 = arith.mulf %21, %26 : vector<8x512xf32>
    %28 = arith.truncf %27 : vector<8x512xf32> to vector<8x512xbf16>
    %c0_16 = arith.constant 0 : index
    %c0_17 = arith.constant 0 : index
    %29 = vector.load %arg6[%c0_16, %c0_17] : memref<512x128xbf16, #tpu.memory_space<vmem>>, vector<512x128xbf16>
    %cst_18 = arith.constant dense<0.000000e+00> : vector<8x128xf32>
    %30 = tpu.matmul %28, %29, %cst_18 {dimension_numbers = #tpu.dot_dimension_numbers<[1], [0], [0], [1], [0, 0, 1, 1], [], []>} : vector<8x512xbf16>, vector<512x128xbf16>, vector<8x128xf32> -> vector<8x128xf32>
    %c0_19 = arith.constant 0 : index
    %c0_20 = arith.constant 0 : index
    %31 = vector.load %arg7[%c0_19, %c0_20] : memref<1x128xf32, #tpu.memory_space<vmem>>, vector<1x128xf32>
    %32 = vector.broadcast %31 : vector<1x128xf32> to vector<8x128xf32>
    %33 = arith.addf %30, %32 : vector<8x128xf32>
    %34 = math.tanh %33 : vector<8x128xf32>
    %c0_21 = arith.constant 0 : index
    %c0_22 = arith.constant 0 : index
    %35 = vector.load %arg8[%c0_21, %c0_22] : memref<8x128xf32, #tpu.memory_space<vmem>>, vector<8x128xf32>
    tpu.vector_store %arg8[%c0_21, %c0_22], %34 {strides = array<i32>} : memref<8x128xf32, #tpu.memory_space<vmem>>, vector<8x128xf32>,
    return
  }
  func.func @transform_0(%arg0: i32) -> (i32, i32) {
    %c0_i32 = arith.constant 0 : i32
    %c0_i32_0 = arith.constant 0 : i32
    return %arg0, %c0_i32 : i32, i32
  }
  func.func @transform_1(%arg0: i32) -> (i32, i32) {
    %c0_i32 = arith.constant 0 : i32
    %c0_i32_0 = arith.constant 0 : i32
    %c0_i32_1 = arith.constant 0 : i32
    return %c0_i32, %c0_i32_0 : i32, i32
  }
  func.func @transform_2(%arg0: i32) -> (i32, i32) {
    %c0_i32 = arith.constant 0 : i32
    %c0_i32_0 = arith.constant 0 : i32
    %c0_i32_1 = arith.constant 0 : i32
    return %c0_i32, %c0_i32_0 : i32, i32
  }
  func.func @transform_3(%arg0: i32) -> (i32, i32) {
    %c0_i32 = arith.constant 0 : i32
    %c0_i32_0 = arith.constant 0 : i32
    %c0_i32_1 = arith.constant 0 : i32
    return %c0_i32, %c0_i32_0 : i32, i32
  }
  func.func @transform_4(%arg0: i32) -> (i32, i32) {
    %c0_i32 = arith.constant 0 : i32
    %c0_i32_0 = arith.constant 0 : i32
    %c0_i32_1 = arith.constant 0 : i32
    return %c0_i32, %c0_i32_0 : i32, i32
  }
  func.func @transform_5(%arg0: i32) -> (i32, i32) {
    %c0_i32 = arith.constant 0 : i32
    %c0_i32_0 = arith.constant 0 : i32
    %c0_i32_1 = arith.constant 0 : i32
    return %c0_i32, %c0_i32_0 : i32, i32
  }
  func.func @transform_6(%arg0: i32) -> (i32, i32) {
    %c0_i32 = arith.constant 0 : i32
    %c0_i32_0 = arith.constant 0 : i32
    %c0_i32_1 = arith.constant 0 : i32
    return %c0_i32, %c0_i32_0 : i32, i32
  }
  func.func @transform_7(%arg0: i32) -> (i32, i32) {
    %c0_i32 = arith.constant 0 : i32
    %c0_i32_0 = arith.constant 0 : i32
    return %arg0, %c0_i32 : i32, i32
  }
}

</mosaic_0001>

<bundles_post_ra>
// kernel: actor_forward.1
= control target key start
LH: loop header
LB: loop body
LE: loop exit
PB: predicated region body
PF: predicated region fallthrough
CT: control target
= control target key end

     0   :  { %v2017_v3 = vmov 0.0   ;;  %vm58_vm0 = vcmask 130048   ;;  %s2608_s1 = inlined_call_operand.vmem [shape: f32[16,512], index: 1, kind: input, shape index: {}]   ;;  %s2609_s0 = inlined_call_operand.vmem [shape: f32[8,16], index: 0, kind: input, shape index: {}]   ;;  %s2610_s3 = inlined_call_operand.vmem [shape: bf16[512,512], index: 3, kind: input, shape index: {}]   ;;  %s2611_s5 = inlined_call_operand.vmem [shape: bf16[512,128], index: 5, kind: input, shape index: {}]   ;;  %s2612_s2 = inlined_call_operand.vmem [shape: f32[1,512], index: 2, kind: input, shape index: {}]   ;;  %s2613_s4 = inlined_call_operand.vmem [shape: f32[1,512], index: 4, kind: input, shape index: {}]   ;;  %s2614_s6 = inlined_call_operand.vmem [shape: f32[1,128], index: 6, kind: input, shape index: {}]   ;;  %s2615_s7 = inlined_call_operand.vmem [shape: f32[8,128], index: 7, kind: output, shape index: {}]  }
   0x1   :  { %v29_v0 = vld [vmem:[%s2608_s1 + $0x8] sm:$0xff]  ;;  %v28_v2 = vld [vmem:[%s2608_s1] sm:$0xff]  ;;  %126 = vmatprep.mubr.f32.mxu0 %v2017_v3  ;;  %197 = vmatprep.mubr.f32.mxu1 %v2017_v3  ;;  %v31_v6 = vld [vmem:[%s2608_s1 + $0x18] sm:$0xff] }
   0x2   :  { %v33_v1 = vld [vmem:[%s2608_s1 + $0x28] sm:$0xff]  ;;  %v32_v5 = vld [vmem:[%s2608_s1 + $0x20] sm:$0xff]  ;;  %v35_v9 = vld [vmem:[%s2608_s1 + $0x38] sm:$0xff] }
   0x3   :  { %v1754_v4 = vpack.c.bf16 %v33_v1, %v29_v0  ;;  %v1756_v7 = vpack.c.bf16 %v32_v5, %v28_v2  ;;  %v27_v8 = vld [vmem:[%s2609_s0] sm:$0xff]  ;;  %v30_v10 = vld [vmem:[%s2608_s1 + $0x10] sm:$0xff]  ;;  %v1758_v12 = vpack.c.bf16 %v35_v9, %v31_v6  ;;  %v1780_v16 = vld [vmem:[%s2610_s3 + $0xc] ss:$16 sps:$4 sm:$0xff]  }
   0x4   :  { %v34_v11 = vld [vmem:[%s2608_s1 + $0x30] sm:$0xff]  ;;  %v1778_v17 = vld [vmem:[%s2610_s3 + $0x8] ss:$16 sps:$4 sm:$0xff]   ;;  %v1786_v20 = vld [vmem:[%s2610_s3 + $0x2c] ss:$16 sps:$4 sm:$0xff]  }
   0x5   :  { %1755 = vmatprep.subr.bf16.mxu0 %v1754_v4  ;;  %v1760_v13 = vpack.c.bf16 %v34_v11, %v30_v10  ;;  %v1775_v14 = vld [vmem:[%s2610_s3] ss:$16 sps:$4 sm:$0xff]   ;;  %v1777_v15 = vld [vmem:[%s2610_s3 + $0x4] ss:$16 sps:$4 sm:$0xff]   ;;  %1759 = vmatprep.subr.bf16.mxu1 %v1758_v12  ;;  %v1784_v22 = vld [vmem:[%s2610_s3 + $0x28] ss:$16 sps:$4 sm:$0xff]  }
   0x6   :  { %1757 = vmatpush1.bf16.msra.mxu0 %v1756_v7  ;;  %v1783_v18 = vld [vmem:[%s2610_s3 + $0x24] ss:$16 sps:$4 sm:$0xff]   ;;  %v1781_v19 = vld [vmem:[%s2610_s3 + $0x20] ss:$16 sps:$4 sm:$0xff]   ;;  %v1792_v23 = vld [vmem:[%s2610_s3 + $0x4c] ss:$16 sps:$4 sm:$0xff]  }
   0x7   :  { %1761 = vmatpush1.bf16.msra.mxu1 %v1760_v13  ;;  %1014 = vmatprep.subr.bf16.mxu0 %v1777_v15  ;;  %v1789_v21 = vld [vmem:[%s2610_s3 + $0x44] ss:$16 sps:$4 sm:$0xff]   ;;  %v1787_v24 = vld [vmem:[%s2610_s3 + $0x40] ss:$16 sps:$4 sm:$0xff]   ;;  %v1790_v26 = vld [vmem:[%s2610_s3 + $0x48] ss:$16 sps:$4 sm:$0xff]  }
   0x8   :  { %1096 = vmatprep.subr.bf16.mxu1 %v1780_v16  ;;  %v1795_v25 = vld [vmem:[%s2610_s3 + $0x64] ss:$16 sps:$4 sm:$0xff]   ;;  %v1798_v27 = vld [vmem:[%s2610_s3 + $0x6c] ss:$16 sps:$4 sm:$0xff]   ;;  %v1793_v28 = vld [vmem:[%s2610_s3 + $0x60] ss:$16 sps:$4 sm:$0xff]   ;;  %v38_v16 = vlaneseq }
   0x9   :  { %1547 = vmatmul.mubr.msk.f32.vlgmr.msra.gmra.mrb[0].mxu0 %vm58_vm0, %v27_v8  ;;  %v1801_v29 = vld [vmem:[%s2610_s3 + $0x84] ss:$16 sps:$4 sm:$0xff]   ;;  %v1796_v30 = vld [vmem:[%s2610_s3 + $0x68] ss:$16 sps:$4 sm:$0xff]   ;;  %v1804_v31 = vld [vmem:[%s2610_s3 + $0x8c] ss:$16 sps:$4 sm:$0xff]  }
   0xa   :  { %1015 = vmatpush1.bf16.msra.mxu0 %v1775_v14  ;;  %1548 = vmatmul.mubr.msk.f32.vlgmr.msra.gmra.mrb[0].mxu1 %vm58_vm0, %v27_v8  ;;  %v1799_v32 = vld [vmem:[%s2610_s3 + $0x80] ss:$16 sps:$4 sm:$0xff]   ;;  %v1807_v33 = vld [vmem:[%s2610_s3 + $0xa4] ss:$16 sps:$4 sm:$0xff]   ;;  %v1802_v34 = vld [vmem:[%s2610_s3 + $0x88] ss:$16 sps:$4 sm:$0xff]  }
   0xb   :  { %1016 = vmatprep.subr.bf16.mxu0 %v1783_v18  ;;  %1097 = vmatpush1.bf16.msra.mxu1 %v1778_v17  ;;  %v1810_v35 = vld [vmem:[%s2610_s3 + $0xac] ss:$16 sps:$4 sm:$0xff]   ;;  %v1805_v36 = vld [vmem:[%s2610_s3 + $0xa0] ss:$16 sps:$4 sm:$0xff]   ;;  %v1813_v37 = vld [vmem:[%s2610_s3 + $0xc4] ss:$16 sps:$4 sm:$0xff]  }
   0xc   :  { %1098 = vmatprep.subr.bf16.mxu1 %v1786_v20  ;;  %v1808_v38 = vld [vmem:[%s2610_s3 + $0xa8] ss:$16 sps:$4 sm:$0xff]   ;;  %v1816_v39 = vld [vmem:[%s2610_s3 + $0xcc] ss:$16 sps:$4 sm:$0xff]   ;;  %v1811_v40 = vld [vmem:[%s2610_s3 + $0xc0] ss:$16 sps:$4 sm:$0xff]  }
   0xd   :  { %v1819_v41 = vld [vmem:[%s2610_s3 + $0xe4] ss:$16 sps:$4 sm:$0xff]   ;;  %v1814_v42 = vld [vmem:[%s2610_s3 + $0xc8] ss:$16 sps:$4 sm:$0xff]   ;;  %v1817_v43 = vld [vmem:[%s2610_s3 + $0xe0] ss:$16 sps:$4 sm:$0xff]  }
   0xe   :  { %1017 = vmatpush1.bf16.msra.mxu0 %v1781_v19  ;;  %v1822_v44 = vld [vmem:[%s2610_s3 + $0xec] ss:$16 sps:$4 sm:$0xff]   ;;  %v1820_v45 = vld [vmem:[%s2610_s3 + $0xe8] ss:$16 sps:$4 sm:$0xff]   ;;  %v1825_v46 = vld [vmem:[%s2610_s3 + $0x104] ss:$16 sps:$4 sm:$0xff]  }
   0xf   :  { %1018 = vmatprep.subr.bf16.mxu0 %v1789_v21  ;;  %1099 = vmatpush1.bf16.msra.mxu1 %v1784_v22  ;;  %v1828_v47 = vld [vmem:[%s2610_s3 + $0x10c] ss:$16 sps:$4 sm:$0xff]   ;;  %v1823_v48 = vld [vmem:[%s2610_s3 + $0x100] ss:$16 sps:$4 sm:$0xff]   ;;  %v1831_v49 = vld [vmem:[%s2610_s3 + $0x124] ss:$16 sps:$4 sm:$0xff]  }
  0x10   :  { %1100 = vmatprep.subr.bf16.mxu1 %v1792_v23  ;;  %v1826_v50 = vld [vmem:[%s2610_s3 + $0x108] ss:$16 sps:$4 sm:$0xff]   ;;  %v1834_v51 = vld [vmem:[%s2610_s3 + $0x12c] ss:$16 sps:$4 sm:$0xff]   ;;  %v1829_v52 = vld [vmem:[%s2610_s3 + $0x120] ss:$16 sps:$4 sm:$0xff]  }
  0x11   :  { %v1837_v53 = vld [vmem:[%s2610_s3 + $0x144] ss:$16 sps:$4 sm:$0xff]   ;;  %v1832_v54 = vld [vmem:[%s2610_s3 + $0x128] ss:$16 sps:$4 sm:$0xff]   ;;  %v1840_v55 = vld [vmem:[%s2610_s3 + $0x14c] ss:$16 sps:$4 sm:$0xff]  }
  0x12   :  { %1019 = vmatpush1.bf16.msra.mxu0 %v1787_v24  ;;  %v1835_v56 = vld [vmem:[%s2610_s3 + $0x140] ss:$16 sps:$4 sm:$0xff]   ;;  %v1838_v57 = vld [vmem:[%s2610_s3 + $0x148] ss:$16 sps:$4 sm:$0xff]   ;;  %v1843_v58 = vld [vmem:[%s2610_s3 + $0x164] ss:$16 sps:$4 sm:$0xff]  }
  0x13   :  { %1020 = vmatprep.subr.bf16.mxu0 %v1795_v25  ;;  %1101 = vmatpush1.bf16.msra.mxu1 %v1790_v26  ;;  %v1846_v59 = vld [vmem:[%s2610_s3 + $0x16c] ss:$16 sps:$4 sm:$0xff]   ;;  %v1841_v60 = vld [vmem:[%s2610_s3 + $0x160] ss:$16 sps:$4 sm:$0xff]   ;;  %v1844_v61 = vld [vmem:[%s2610_s3 + $0x168] ss:$16 sps:$4 sm:$0xff]  }
  0x14   :  { %1102 = vmatprep.subr.bf16.mxu1 %v1798_v27  ;;  %v1849_v62 = vld [vmem:[%s2610_s3 + $0x184] ss:$16 sps:$4 sm:$0xff]   ;;  %v1852_v63 = vld [vmem:[%s2610_s3 + $0x18c] ss:$16 sps:$4 sm:$0xff]   ;;  %v1847_v0 = vld [vmem:[%s2610_s3 + $0x180] ss:$16 sps:$4 sm:$0xff]  }
  0x15   :  { %v1850_v1 = vld [vmem:[%s2610_s3 + $0x188] ss:$16 sps:$4 sm:$0xff]   ;;  %v1855_v2 = vld [vmem:[%s2610_s3 + $0x1a4] ss:$16 sps:$4 sm:$0xff]   ;;  %v1858_v3 = vld [vmem:[%s2610_s3 + $0x1ac] ss:$16 sps:$4 sm:$0xff]  }
  0x16   :  { %1021 = vmatpush1.bf16.msra.mxu0 %v1793_v28  ;;  %v1853_v4 = vld [vmem:[%s2610_s3 + $0x1a0] ss:$16 sps:$4 sm:$0xff]   ;;  %v1856_v5 = vld [vmem:[%s2610_s3 + $0x1a8] ss:$16 sps:$4 sm:$0xff]   ;;  %v1861_v6 = vld [vmem:[%s2610_s3 + $0x1c4] ss:$16 sps:$4 sm:$0xff]  }
  0x17   :  { %1022 = vmatprep.subr.bf16.mxu0 %v1801_v29  ;;  %1103 = vmatpush1.bf16.msra.mxu1 %v1796_v30  ;;  %v1864_v7 = vld [vmem:[%s2610_s3 + $0x1cc] ss:$16 sps:$4 sm:$0xff]   ;;  %v1859_v8 = vld [vmem:[%s2610_s3 + $0x1c0] ss:$16 sps:$4 sm:$0xff]   ;;  %v1862_v9 = vld [vmem:[%s2610_s3 + $0x1c8] ss:$16 sps:$4 sm:$0xff]  }
  0x18   :  { %1104 = vmatprep.subr.bf16.mxu1 %v1804_v31  ;;  %v1867_v10 = vld [vmem:[%s2610_s3 + $0x1e4] ss:$16 sps:$4 sm:$0xff]   ;;  %v1870_v11 = vld [vmem:[%s2610_s3 + $0x1ec] ss:$16 sps:$4 sm:$0xff]   ;;  %v1865_v12 = vld [vmem:[%s2610_s3 + $0x1e0] ss:$16 sps:$4 sm:$0xff]  }
  0x19   :  { %v1868_v13 = vld [vmem:[%s2610_s3 + $0x1e8] ss:$16 sps:$4 sm:$0xff]   ;;  %v1873_v14 = vld [vmem:[%s2610_s3 + $0x204] ss:$16 sps:$4 sm:$0xff]   ;;  %v1876_v15 = vld [vmem:[%s2610_s3 + $0x20c] ss:$16 sps:$4 sm:$0xff]  }
  0x1a   :  { %1023 = vmatpush1.bf16.msra.mxu0 %v1799_v32  ;;  %v2283_v17 = vshrl.u32 %v38_v16, 7  ;;  %v2289_v19 = vld [vmem:[%s2612_s2] sm:$0xf] }
  0x1b   :  { %1024 = vmatprep.subr.bf16.mxu0 %v1807_v33  ;;  %1105 = vmatpush1.bf16.msra.mxu1 %v1802_v34 }
  0x1c   :  { %1106 = vmatprep.subr.bf16.mxu1 %v1810_v35  ;;  %v40_v18 = vsub.s32 0, %v2283_v17  ;;  %v44_v20 = vsub.s32 1, %v2283_v17  ;;  %v52_v21 = vsub.s32 3, %v2283_v17 }
  0x1e   :  { %1025 = vmatpush1.bf16.msra.mxu0 %v1805_v36  ;;  %v41_v22 = vrot.slane %v2289_v19, %v40_v18  ;;  %v45_v23 = vrot.slane %v2289_v19, %v44_v20  ;;  %v53_v25 = vrot.slane %v2289_v19, %v52_v21 }
  0x1f   :  { %1026 = vmatprep.subr.bf16.mxu0 %v1813_v37  ;;  %1107 = vmatpush1.bf16.msra.mxu1 %v1808_v38 }
  0x20   :  { %1108 = vmatprep.subr.bf16.mxu1 %v1816_v39 }
  0x22   :  { %1027 = vmatpush1.bf16.msra.mxu0 %v1811_v40 }
  0x23   :  { %1028 = vmatprep.subr.bf16.mxu0 %v1819_v41  ;;  %1109 = vmatpush1.bf16.msra.mxu1 %v1814_v42 }
  0x24   :  { %1110 = vmatprep.subr.bf16.mxu1 %v1822_v44  ;;  %v1871_v44 = vld [vmem:[%s2610_s3 + $0x200] ss:$16 sps:$4 sm:$0xff]  }
  0x26   :  { %1029 = vmatpush1.bf16.msra.mxu0 %v1817_v43 }
  0x27   :  { %1030 = vmatprep.subr.bf16.mxu0 %v1825_v46  ;;  %1111 = vmatpush1.bf16.msra.mxu1 %v1820_v45  ;;  %v1874_v45 = vld [vmem:[%s2610_s3 + $0x208] ss:$16 sps:$4 sm:$0xff]  }
  0x28   :  { %1112 = vmatprep.subr.bf16.mxu1 %v1828_v47 }
  0x2a   :  { %1031 = vmatpush1.bf16.msra.mxu0 %v1823_v48  ;;  %v1879_v48 = vld [vmem:[%s2610_s3 + $0x224] ss:$16 sps:$4 sm:$0xff]  }
  0x2b   :  { %1032 = vmatprep.subr.bf16.mxu0 %v1831_v49  ;;  %1113 = vmatpush1.bf16.msra.mxu1 %v1826_v50  ;;  %v1882_v49 = vld [vmem:[%s2610_s3 + $0x22c] ss:$16 sps:$4 sm:$0xff]  }
  0x2c   :  { %1114 = vmatprep.subr.bf16.mxu1 %v1834_v51  ;;  %v1877_v51 = vld [vmem:[%s2610_s3 + $0x220] ss:$16 sps:$4 sm:$0xff]  }
  0x2e   :  { %1033 = vmatpush1.bf16.msra.mxu0 %v1829_v52  ;;  %v1880_v52 = vld [vmem:[%s2610_s3 + $0x228] ss:$16 sps:$4 sm:$0xff]  }
  0x2f   :  { %1034 = vmatprep.subr.bf16.mxu0 %v1837_v53  ;;  %1115 = vmatpush1.bf16.msra.mxu1 %v1832_v54  ;;  %v1885_v53 = vld [vmem:[%s2610_s3 + $0x244] ss:$16 sps:$4 sm:$0xff]   ;;  %v1888_v54 = vld [vmem:[%s2610_s3 + $0x24c] ss:$16 sps:$4 sm:$0xff]  }
  0x30   :  { %1116 = vmatprep.subr.bf16.mxu1 %v1840_v55  ;;  %v1883_v55 = vld [vmem:[%s2610_s3 + $0x240] ss:$16 sps:$4 sm:$0xff]  }
  0x32   :  { %1035 = vmatpush1.bf16.msra.mxu0 %v1835_v56  ;;  %v1886_v56 = vld [vmem:[%s2610_s3 + $0x248] ss:$16 sps:$4 sm:$0xff]  }
  0x33   :  { %1117 = vmatpush1.bf16.msra.mxu1 %v1838_v57  ;;  %1036 = vmatprep.subr.bf16.mxu0 %v1843_v58  ;;  %v1891_v57 = vld [vmem:[%s2610_s3 + $0x264] ss:$16 sps:$4 sm:$0xff]   ;;  %v1894_v58 = vld [vmem:[%s2610_s3 + $0x26c] ss:$16 sps:$4 sm:$0xff]  }
  0x34   :  { %1118 = vmatprep.subr.bf16.mxu1 %v1846_v59  ;;  %v1889_v59 = vld [vmem:[%s2610_s3 + $0x260] ss:$16 sps:$4 sm:$0xff]  }
  0x36   :  { %1037 = vmatpush1.bf16.msra.mxu0 %v1841_v60  ;;  %v1892_v60 = vld [vmem:[%s2610_s3 + $0x268] ss:$16 sps:$4 sm:$0xff]  }
  0x37   :  { %1119 = vmatpush1.bf16.msra.mxu1 %v1844_v61  ;;  %1038 = vmatprep.subr.bf16.mxu0 %v1849_v62  ;;  %v1897_v61 = vld [vmem:[%s2610_s3 + $0x284] ss:$16 sps:$4 sm:$0xff]   ;;  %v1900_v62 = vld [vmem:[%s2610_s3 + $0x28c] ss:$16 sps:$4 sm:$0xff]  }
  0x38   :  { %1120 = vmatprep.subr.bf16.mxu1 %v1852_v63  ;;  %v1895_v63 = vld [vmem:[%s2610_s3 + $0x280] ss:$16 sps:$4 sm:$0xff]  }
  0x3a   :  { %1039 = vmatpush1.bf16.msra.mxu0 %v1847_v0  ;;  %v1898_v0 = vld [vmem:[%s2610_s3 + $0x288] ss:$16 sps:$4 sm:$0xff]  }
  0x3b   :  { %1121 = vmatpush1.bf16.msra.mxu1 %v1850_v1  ;;  %1040 = vmatprep.subr.bf16.mxu0 %v1855_v2  ;;  %v1903_v1 = vld [vmem:[%s2610_s3 + $0x2a4] ss:$16 sps:$4 sm:$0xff]   ;;  %v1906_v2 = vld [vmem:[%s2610_s3 + $0x2ac] ss:$16 sps:$4 sm:$0xff]  }
  0x3c   :  { %1122 = vmatprep.subr.bf16.mxu1 %v1858_v3  ;;  %v1901_v3 = vld [vmem:[%s2610_s3 + $0x2a0] ss:$16 sps:$4 sm:$0xff]  }
  0x3e   :  { %1041 = vmatpush1.bf16.msra.mxu0 %v1853_v4  ;;  %v1904_v4 = vld [vmem:[%s2610_s3 + $0x2a8] ss:$16 sps:$4 sm:$0xff]  }
  0x3f   :  { %1123 = vmatpush1.bf16.msra.mxu1 %v1856_v5  ;;  %1042 = vmatprep.subr.bf16.mxu0 %v1861_v6  ;;  %v1909_v5 = vld [vmem:[%s2610_s3 + $0x2c4] ss:$16 sps:$4 sm:$0xff]   ;;  %v1912_v6 = vld [vmem:[%s2610_s3 + $0x2cc] ss:$16 sps:$4 sm:$0xff]  }
  0x40   :  { %1124 = vmatprep.subr.bf16.mxu1 %v1864_v7  ;;  %v1907_v7 = vld [vmem:[%s2610_s3 + $0x2c0] ss:$16 sps:$4 sm:$0xff]  }
  0x42   :  { %1043 = vmatpush1.bf16.msra.mxu0 %v1859_v8  ;;  %v1910_v8 = vld [vmem:[%s2610_s3 + $0x2c8] ss:$16 sps:$4 sm:$0xff]  }
  0x43   :  { %1125 = vmatpush1.bf16.msra.mxu1 %v1862_v9  ;;  %1044 = vmatprep.subr.bf16.mxu0 %v1867_v10  ;;  %v1915_v9 = vld [vmem:[%s2610_s3 + $0x2e4] ss:$16 sps:$4 sm:$0xff]   ;;  %v1918_v10 = vld [vmem:[%s2610_s3 + $0x2ec] ss:$16 sps:$4 sm:$0xff]  }
  0x44   :  { %1126 = vmatprep.subr.bf16.mxu1 %v1870_v11  ;;  %v48_v11 = vsub.s32 2, %v2283_v17 }
  0x46   :  { %1045 = vmatpush1.bf16.msra.mxu0 %v1865_v12  ;;  %v1913_v12 = vld [vmem:[%s2610_s3 + $0x2e0] ss:$16 sps:$4 sm:$0xff]   ;;  %v49_v16 = vrot.slane %v2289_v19, %v48_v11  ;;  %v1930_v19 = vld [vmem:[%s2610_s3 + $0x32c] ss:$16 sps:$4 sm:$0xff]  }
  0x47   :  { %1127 = vmatpush1.bf16.msra.mxu1 %v1868_v13  ;;  %1055 = vmatprep.subr.bf16.mxu0 %v1873_v14  ;;  %v1916_v13 = vld [vmem:[%s2610_s3 + $0x2e8] ss:$16 sps:$4 sm:$0xff]   ;;  %v1921_v14 = vld [vmem:[%s2610_s3 + $0x304] ss:$16 sps:$4 sm:$0xff]  }
  0x48   :  { %1137 = vmatprep.subr.bf16.mxu1 %v1876_v15  ;;  %v1924_v15 = vld [vmem:[%s2610_s3 + $0x30c] ss:$16 sps:$4 sm:$0xff]  }
  0xdc   :  { %v128_v24 = vpop.f32.mrb[0].mxu0 }
  0xdd   :  { %v129_v26 = vadd.f32 %v128_v24, %v41_v22  ;;  %v130_v27 = vpop.f32.mrb[1].mxu0  ;;  %v2302_v29 = vpop.f32.mrb[0].mxu1  ;;  %v1919_v22 = vld [vmem:[%s2610_s3 + $0x300] ss:$16 sps:$4 sm:$0xff]   ;;  %v1927_v24 = vld [vmem:[%s2610_s3 + $0x324] ss:$16 sps:$4 sm:$0xff]  }
  0xde   :  { %v131_v28 = vadd.f32 %v130_v27, %v45_v23  ;;  %v201_v31 = vpop.f32.mrb[1].mxu1  ;;  %v1922_v23 = vld [vmem:[%s2610_s3 + $0x308] ss:$16 sps:$4 sm:$0xff]  }
  0xdf   :  { %v204_v30 = vmul.f32 0.5, %v129_v26  ;;  %v202_v33 = vadd.f32 %v201_v31, %v53_v25  ;;  %v200_v25 = vadd.f32 %v2302_v29, %v49_v16  ;;  %v1925_v26 = vld [vmem:[%s2610_s3 + $0x320] ss:$16 sps:$4 sm:$0xff]   ;;  %v1928_v27 = vld [vmem:[%s2610_s3 + $0x328] ss:$16 sps:$4 sm:$0xff]  }
  0xe0   :  { %v205_v32 = vmul.f32 0.5, %v131_v28  ;;  %v1933_v28 = vld [vmem:[%s2610_s3 + $0x344] ss:$16 sps:$4 sm:$0xff]   ;;  %v1936_v29 = vld [vmem:[%s2610_s3 + $0x34c] ss:$16 sps:$4 sm:$0xff]  }
  0xe1   :  { %1999 = vtanh.f32 %v204_v30  ;;  %v207_v34 = vmul.f32 0.5, %v202_v33  ;;  %v1931_v31 = vld [vmem:[%s2610_s3 + $0x340] ss:$16 sps:$4 sm:$0xff]   ;;  %v1939_v33 = vld [vmem:[%s2610_s3 + $0x364] ss:$16 sps:$4 sm:$0xff]   ;;  %v1989_v16 = vld [vmem:[%s2611_s5 + $0x28] sm:$0xff]  }
  0xe2   :  { %2001 = vtanh.f32 %v205_v32 }
  0xe3   :  { %2003 = vtanh.f32 %v207_v34 }
  0xeb   :  { %v2000_v35 = vpop.eup %1999 }
  0xec   :  { %v2002_v36 = vpop.eup %2001  ;;  %v212_v37 = vadd.f32 1.0, %v2000_v35  ;;  %v1937_v35 = vld [vmem:[%s2610_s3 + $0x360] ss:$16 sps:$4 sm:$0xff]  }
  0xed   :  { %v213_v38 = vadd.f32 1.0, %v2002_v36  ;;  %v2004_v39 = vpop.eup %2003  ;;  %v1940_v36 = vld [vmem:[%s2610_s3 + $0x368] ss:$16 sps:$4 sm:$0xff]  }
  0xee   :  { %v216_v40 = vmul.f32 %v212_v37, %v204_v30  ;;  %v215_v42 = vadd.f32 1.0, %v2004_v39  ;;  %v206_v30 = vmul.f32 0.5, %v200_v25  ;;  %v1945_v37 = vld [vmem:[%s2610_s3 + $0x384] ss:$16 sps:$4 sm:$0xff]   ;;  %v1943_v39 = vld [vmem:[%s2610_s3 + $0x380] ss:$16 sps:$4 sm:$0xff]  }
  0xef   :  { %v217_v41 = vmul.f32 %v213_v38, %v205_v32  ;;  %v1934_v32 = vld [vmem:[%s2610_s3 + $0x348] ss:$16 sps:$4 sm:$0xff]   ;;  %v1948_v38 = vld [vmem:[%s2610_s3 + $0x38c] ss:$16 sps:$4 sm:$0xff]   ;;  %v1994_v25 = vld [vmem:[%s2611_s5 + $0xb0] sm:$0xff]  }
  0xf0   :  { %v219_v46 = vmul.f32 %v215_v42, %v207_v34  ;;  %v220_v47 = vpack.c.bf16 %v216_v40, %v216_v40  ;;  %v1942_v34 = vld [vmem:[%s2610_s3 + $0x36c] ss:$16 sps:$4 sm:$0xff]   ;;  %2005 = vtanh.f32 %v206_v30  ;;  %v1946_v40 = vld [vmem:[%s2610_s3 + $0x388] ss:$16 sps:$4 sm:$0xff]  }
  0xf1   :  { %v221_v43 = vpack.c.bf16 %v217_v41, %v217_v41  ;;  %v1951_v41 = vld [vmem:[%s2610_s3 + $0x3a4] ss:$16 sps:$4 sm:$0xff]   ;;  %v1954_v42 = vld [vmem:[%s2610_s3 + $0x3ac] ss:$16 sps:$4 sm:$0xff]  }
  0xf2   :  { %v223_v50 = vpack.c.bf16 %v219_v46, %v219_v46  ;;  %v1960_v46 = vld [vmem:[%s2610_s3 + $0x3cc] ss:$16 sps:$4 sm:$0xff]  }
  0xf3   :  { %1046 = vmatprep.mubr.bf16.mxu0 %v221_v43  ;;  %1128 = vmatprep.mubr.bf16.mxu1 %v221_v43  ;;  %v1949_v43 = vld [vmem:[%s2610_s3 + $0x3a0] ss:$16 sps:$4 sm:$0xff]  }
  0xf4   :  { %1047 = vmatmul.mubr.bf16.vlgmr.msra.gmra.mrb[4].mxu0 %v220_v47  ;;  %1129 = vmatmul.mubr.bf16.vlgmr.msra.gmra.mrb[4].mxu1 %v220_v47 }
  0xf5   :  { %1056 = vmatpush1.bf16.msra.mxu0 %v1871_v44  ;;  %1138 = vmatpush1.bf16.msra.mxu1 %v1874_v45  ;;  %v1952_v44 = vld [vmem:[%s2610_s3 + $0x3a8] ss:$16 sps:$4 sm:$0xff]   ;;  %v1957_v45 = vld [vmem:[%s2610_s3 + $0x3c4] ss:$16 sps:$4 sm:$0xff]  }
  0xf6   :  { %1057 = vmatprep.subr.bf16.mxu0 %v1879_v48  ;;  %1139 = vmatprep.subr.bf16.mxu1 %v1882_v49  ;;  %v1955_v48 = vld [vmem:[%s2610_s3 + $0x3c0] ss:$16 sps:$4 sm:$0xff]   ;;  %v1958_v49 = vld [vmem:[%s2610_s3 + $0x3c8] ss:$16 sps:$4 sm:$0xff]  }
  0xf7   :  { %1087 = vmatprep.mubr.bf16.mxu0 %v223_v50  ;;  %1169 = vmatprep.mubr.bf16.mxu1 %v223_v50 }
  0xf9   :  { %1058 = vmatpush1.bf16.msra.mxu0 %v1877_v51  ;;  %1140 = vmatpush1.bf16.msra.mxu1 %v1880_v52  ;;  %v1963_v51 = vld [vmem:[%s2610_s3 + $0x3e4] ss:$16 sps:$4 sm:$0xff]   ;;  %v1966_v52 = vld [vmem:[%s2610_s3 + $0x3ec] ss:$16 sps:$4 sm:$0xff]  }
  0xfa   :  { %1059 = vmatprep.subr.bf16.mxu0 %v1885_v53  ;;  %1141 = vmatprep.subr.bf16.mxu1 %v1888_v54  ;;  %v2006_v47 = vpop.eup %2005  ;;  %v1961_v53 = vld [vmem:[%s2610_s3 + $0x3e0] ss:$16 sps:$4 sm:$0xff]   ;;  %v1964_v54 = vld [vmem:[%s2610_s3 + $0x3e8] ss:$16 sps:$4 sm:$0xff]  }
  0xfb   :  { %v214_v50 = vadd.f32 1.0, %v2006_v47 }
  0xfd   :  { %1060 = vmatpush1.bf16.msra.mxu0 %v1883_v55  ;;  %1142 = vmatpush1.bf16.msra.mxu1 %v1886_v56  ;;  %v218_v55 = vmul.f32 %v214_v50, %v206_v30  ;;  %v1967_v56 = vld [vmem:[%s2611_s5 + $0x40] sm:$0xff]  }
  0xfe   :  { %1061 = vmatprep.subr.bf16.mxu0 %v1891_v57  ;;  %1143 = vmatprep.subr.bf16.mxu1 %v1894_v58  ;;  %v1968_v57 = vld [vmem:[%s2611_s5 + $0xc0] sm:$0xff]  }
  0xff   :  { %v1969_v58 = vld [vmem:[%s2611_s5] sm:$0xff]  }
 0x100   :  { %v352_v30 = vld [vmem:[%s2613_s4] sm:$0xf] }
 0x101   :  { %1062 = vmatpush1.bf16.msra.mxu0 %v1889_v59  ;;  %1144 = vmatpush1.bf16.msra.mxu1 %v1892_v60  ;;  %v1970_v59 = vld [vmem:[%s2611_s5 + $0x80] sm:$0xff]   ;;  %v222_v60 = vpack.c.bf16 %v218_v55, %v218_v55 }
 0x102   :  { %1063 = vmatprep.subr.bf16.mxu0 %v1897_v61  ;;  %1145 = vmatprep.subr.bf16.mxu1 %v1900_v62  ;;  %v1971_v61 = vld [vmem:[%s2611_s5 + $0x48] sm:$0xff]  }
 0x103   :  { %v1972_v62 = vld [vmem:[%s2611_s5 + $0xc8] sm:$0xff]  }
 0x105   :  { %1064 = vmatpush1.bf16.msra.mxu0 %v1895_v63  ;;  %1146 = vmatpush1.bf16.msra.mxu1 %v1898_v0  ;;  %v1973_v63 = vld [vmem:[%s2611_s5 + $0x8] sm:$0xff]  }
 0x106   :  { %1065 = vmatprep.subr.bf16.mxu0 %v1903_v1  ;;  %1147 = vmatprep.subr.bf16.mxu1 %v1906_v2  ;;  %v1974_v0 = vld [vmem:[%s2611_s5 + $0x88] sm:$0xff]   ;;  %v1975_v1 = vld [vmem:[%s2611_s5 + $0x50] sm:$0xff]  }
 0x107   :  { %v1976_v2 = vld [vmem:[%s2611_s5 + $0xd0] sm:$0xff]  }
 0x109   :  { %1066 = vmatpush1.bf16.msra.mxu0 %v1901_v3  ;;  %1148 = vmatpush1.bf16.msra.mxu1 %v1904_v4  ;;  %v1977_v3 = vld [vmem:[%s2611_s5 + $0x10] sm:$0xff]  }
 0x10a   :  { %1067 = vmatprep.subr.bf16.mxu0 %v1909_v5  ;;  %1149 = vmatprep.subr.bf16.mxu1 %v1912_v6  ;;  %v1978_v4 = vld [vmem:[%s2611_s5 + $0x90] sm:$0xff]   ;;  %v1979_v5 = vld [vmem:[%s2611_s5 + $0x58] sm:$0xff]  }
 0x10b   :  { %v1980_v6 = vld [vmem:[%s2611_s5 + $0xd8] sm:$0xff]  }
 0x10d   :  { %1068 = vmatpush1.bf16.msra.mxu0 %v1907_v7  ;;  %1150 = vmatpush1.bf16.msra.mxu1 %v1910_v8  ;;  %v1981_v7 = vld [vmem:[%s2611_s5 + $0x18] sm:$0xff]  }
 0x10e   :  { %1069 = vmatprep.subr.bf16.mxu0 %v1915_v9  ;;  %1151 = vmatprep.subr.bf16.mxu1 %v1918_v10  ;;  %v1982_v8 = vld [vmem:[%s2611_s5 + $0x98] sm:$0xff]   ;;  %v1983_v9 = vld [vmem:[%s2611_s5 + $0x60] sm:$0xff]  }
 0x10f   :  { %v1984_v10 = vld [vmem:[%s2611_s5 + $0xe0] sm:$0xff]  }
 0x111   :  { %1070 = vmatpush1.bf16.msra.mxu0 %v1913_v12  ;;  %1152 = vmatpush1.bf16.msra.mxu1 %v1916_v13  ;;  %v1985_v12 = vld [vmem:[%s2611_s5 + $0x20] sm:$0xff]  }
 0x112   :  { %1071 = vmatprep.subr.bf16.mxu0 %v1921_v14  ;;  %1153 = vmatprep.subr.bf16.mxu1 %v1924_v15  ;;  %v1986_v13 = vld [vmem:[%s2611_s5 + $0xa0] sm:$0xff]   ;;  %v1987_v14 = vld [vmem:[%s2611_s5 + $0x68] sm:$0xff]  }
 0x113   :  { %v1988_v15 = vld [vmem:[%s2611_s5 + $0xe8] sm:$0xff]  }
 0x115   :  { %1072 = vmatpush1.bf16.msra.mxu0 %v1919_v22  ;;  %1154 = vmatpush1.bf16.msra.mxu1 %v1922_v23  ;;  %v1990_v22 = vld [vmem:[%s2611_s5 + $0xa8] sm:$0xff]   ;;  %v1991_v23 = vld [vmem:[%s2611_s5 + $0x70] sm:$0xff]  }
 0x116   :  { %1073 = vmatprep.subr.bf16.mxu0 %v1927_v24  ;;  %1155 = vmatprep.subr.bf16.mxu1 %v1930_v19  ;;  %v1992_v24 = vld [vmem:[%s2611_s5 + $0xf0] sm:$0xff]  }
 0x117   :  { %v1993_v19 = vld [vmem:[%s2611_s5 + $0x30] sm:$0xff]  }
 0x119   :  { %1074 = vmatpush1.bf16.msra.mxu0 %v1925_v26  ;;  %1156 = vmatpush1.bf16.msra.mxu1 %v1928_v27  ;;  %v1995_v26 = vld [vmem:[%s2611_s5 + $0x78] sm:$0xff]  }
 0x11a   :  { %1075 = vmatprep.subr.bf16.mxu0 %v1933_v28  ;;  %1157 = vmatprep.subr.bf16.mxu1 %v1936_v29  ;;  %v1996_v27 = vld [vmem:[%s2611_s5 + $0xf8] sm:$0xff]  }
 0x11b   :  { %v1997_v28 = vld [vmem:[%s2611_s5 + $0x38] sm:$0xff]  }
 0x11c   :  { %v1998_v29 = vld [vmem:[%s2611_s5 + $0xb8] sm:$0xff]  }
 0x11d   :  { %1076 = vmatpush1.bf16.msra.mxu0 %v1931_v31  ;;  %1158 = vmatpush1.bf16.msra.mxu1 %v1934_v32  ;;  %v357_v31 = vrot.slane %v352_v30, %v40_v18  ;;  %v365_v32 = vrot.slane %v352_v30, %v48_v11 }
 0x11e   :  { %1077 = vmatprep.subr.bf16.mxu0 %v1939_v33  ;;  %1159 = vmatprep.subr.bf16.mxu1 %v1942_v34  ;;  %v361_v33 = vrot.slane %v352_v30, %v44_v20  ;;  %v369_v34 = vrot.slane %v352_v30, %v52_v21 }
 0x121   :  { %1078 = vmatpush1.bf16.msra.mxu0 %v1937_v35  ;;  %1160 = vmatpush1.bf16.msra.mxu1 %v1940_v36 }
 0x122   :  { %1079 = vmatprep.subr.bf16.mxu0 %v1945_v37  ;;  %1161 = vmatprep.subr.bf16.mxu1 %v1948_v38 }
 0x125   :  { %1080 = vmatpush1.bf16.msra.mxu0 %v1943_v39  ;;  %1162 = vmatpush1.bf16.msra.mxu1 %v1946_v40 }
 0x126   :  { %1081 = vmatprep.subr.bf16.mxu0 %v1951_v41  ;;  %1163 = vmatprep.subr.bf16.mxu1 %v1954_v42 }
 0x129   :  { %1082 = vmatpush1.bf16.msra.mxu0 %v1949_v43  ;;  %1164 = vmatpush1.bf16.msra.mxu1 %v1952_v44 }
 0x12a   :  { %1083 = vmatprep.subr.bf16.mxu0 %v1957_v45  ;;  %1165 = vmatprep.subr.bf16.mxu1 %v1960_v46 }
 0x12d   :  { %1084 = vmatpush1.bf16.msra.mxu0 %v1955_v48  ;;  %1166 = vmatpush1.bf16.msra.mxu1 %v1958_v49 }
 0x12e   :  { %1085 = vmatprep.subr.bf16.mxu0 %v1963_v51  ;;  %1167 = vmatprep.subr.bf16.mxu1 %v1966_v52 }
 0x131   :  { %1086 = vmatpush1.bf16.msra.mxu0 %v1961_v53  ;;  %1168 = vmatpush1.bf16.msra.mxu1 %v1964_v54 }
 0x132   :  { %1710 = vmatprep.subr.bf16.mxu0 %v1967_v56  ;;  %1732 = vmatprep.subr.bf16.mxu1 %v1968_v57 }
 0x134   :  { %1088 = vmatmul.mubr.bf16.vlgmr.msra.gmra.mrb[4].mxu0 %v222_v60  ;;  %1170 = vmatmul.mubr.bf16.vlgmr.msra.gmra.mrb[4].mxu1 %v222_v60 }
 0x135   :  { %1711 = vmatpush3.bf16.msra.mxu0 %v1969_v58  ;;  %1733 = vmatpush3.bf16.msra.mxu1 %v1970_v59 }
 0x136   :  { %1712 = vmatprep.subr.bf16.mxu0 %v1971_v61  ;;  %1734 = vmatprep.subr.bf16.mxu1 %v1972_v62 }
 0x139   :  { %1713 = vmatpush3.bf16.msra.mxu0 %v1973_v63  ;;  %1735 = vmatpush3.bf16.msra.mxu1 %v1974_v0  ;;  %v1677_v0 = vld [vmem:[%s2614_s6] ss:$0 sm:$0xff] }
 0x13a   :  { %1714 = vmatprep.subr.bf16.mxu0 %v1975_v1  ;;  %1736 = vmatprep.subr.bf16.mxu1 %v1976_v2 }
 0x13d   :  { %1715 = vmatpush3.bf16.msra.mxu0 %v1977_v3  ;;  %1737 = vmatpush3.bf16.msra.mxu1 %v1978_v4 }
 0x13e   :  { %1716 = vmatprep.subr.bf16.mxu0 %v1979_v5  ;;  %1738 = vmatprep.subr.bf16.mxu1 %v1980_v6 }
 0x141   :  { %1717 = vmatpush3.bf16.msra.mxu0 %v1981_v7  ;;  %1739 = vmatpush3.bf16.msra.mxu1 %v1982_v8 }
 0x142   :  { %1718 = vmatprep.subr.bf16.mxu0 %v1983_v9  ;;  %1740 = vmatprep.subr.bf16.mxu1 %v1984_v10 }
 0x145   :  { %1719 = vmatpush3.bf16.msra.mxu0 %v1985_v12  ;;  %1741 = vmatpush3.bf16.msra.mxu1 %v1986_v13 }
 0x146   :  { %1720 = vmatprep.subr.bf16.mxu0 %v1987_v14  ;;  %1742 = vmatprep.subr.bf16.mxu1 %v1988_v15 }
 0x149   :  { %1721 = vmatpush3.bf16.msra.mxu0 %v1989_v16  ;;  %1743 = vmatpush3.bf16.msra.mxu1 %v1990_v22 }
 0x14a   :  { %1722 = vmatprep.subr.bf16.mxu0 %v1991_v23  ;;  %1744 = vmatprep.subr.bf16.mxu1 %v1992_v24 }
 0x14d   :  { %1723 = vmatpush3.bf16.msra.mxu0 %v1993_v19  ;;  %1745 = vmatpush3.bf16.msra.mxu1 %v1994_v25 }
 0x14e   :  { %1724 = vmatprep.subr.bf16.mxu0 %v1995_v26  ;;  %1746 = vmatprep.subr.bf16.mxu1 %v1996_v27 }
 0x151   :  { %1725 = vmatpush3.bf16.msra.mxu0 %v1997_v28  ;;  %1747 = vmatpush3.bf16.msra.mxu1 %v1998_v29 }
 0x207   :  { %v1089_v35 = vpop.f32.mrb[4].mxu0  ;;  %v1171_v36 = vpop.f32.mrb[4].mxu1 }
 0x208   :  { %v1762_v37 = vadd.f32 %v1089_v35, %v357_v31  ;;  %v1764_v38 = vadd.f32 %v1171_v36, %v365_v32  ;;  %v1091_v39 = vpop.f32.mrb[5].mxu0  ;;  %v1173_v40 = vpop.f32.mrb[5].mxu1 }
 0x209   :  { %v1763_v41 = vadd.f32 %v1091_v39, %v361_v33  ;;  %v1765_v42 = vadd.f32 %v1173_v40, %v369_v34  ;;  %v1093_v43 = vpop.f32.mrb[6].mxu0  ;;  %v1175_v44 = vpop.f32.mrb[6].mxu1 }
 0x20a   :  { %v1178_v18 = vmul.f32 0.5, %v1762_v37  ;;  %v1180_v45 = vmul.f32 0.5, %v1764_v38  ;;  %v1094_v46 = vpop.f32.mrb[7].mxu0  ;;  %v1176_v11 = vpop.f32.mrb[7].mxu1 }
 0x20b   :  { %v1179_v47 = vmul.f32 0.5, %v1763_v41  ;;  %v1181_v48 = vmul.f32 0.5, %v1765_v42 }
 0x20c   :  { %2007 = vtanh.f32 %v1178_v18 }
 0x20d   :  { %2009 = vtanh.f32 %v1180_v45 }
 0x20e   :  { %2011 = vtanh.f32 %v1179_v47 }
 0x20f   :  { %2013 = vtanh.f32 %v1181_v48 }
 0x216   :  { %v2008_v17 = vpop.eup %2007 }
 0x217   :  { %v2010_v20 = vpop.eup %2009  ;;  %v1186_v21 = vadd.f32 1.0, %v2008_v17 }
 0x218   :  { %v2012_v49 = vpop.eup %2011  ;;  %v1188_v50 = vadd.f32 1.0, %v2010_v20 }
 0x219   :  { %v2014_v51 = vpop.eup %2013  ;;  %v1187_v52 = vadd.f32 1.0, %v2012_v49  ;;  %v1190_v53 = vmul.f32 %v1186_v21, %v1178_v18 }
 0x21a   :  { %v1189_v54 = vadd.f32 1.0, %v2014_v51  ;;  %v1192_v55 = vmul.f32 %v1188_v50, %v1180_v45 }
 0x21b   :  { %v1191_v56 = vmul.f32 %v1187_v52, %v1179_v47  ;;  %v1194_v59 = vpack.c.bf16 %v1190_v53, %v1190_v53 }
 0x21c   :  { %v1193_v57 = vmul.f32 %v1189_v54, %v1181_v48  ;;  %v1196_v61 = vpack.c.bf16 %v1192_v55, %v1192_v55 }
 0x21d   :  { %v1195_v58 = vpack.c.bf16 %v1191_v56, %v1191_v56 }
 0x21e   :  { %v1197_v60 = vpack.c.bf16 %v1193_v57, %v1193_v57 }
 0x21f   :  { %1493 = vmatprep.mubr.bf16.mxu0 %v1195_v58 }
 0x220   :  { %1533 = vmatprep.mubr.bf16.mxu1 %v1197_v60  ;;  %1494 = vmatmul.mubr.bf16.vlgmr.msra.gmra.mrb[8].mxu0 %v1194_v59 }
 0x221   :  { %1534 = vmatmul.mubr.bf16.vlgmr.msra.gmra.mrb[8].mxu1 %v1196_v61 }
 0x2f3   :  { %v1726_v62 = vpop.f32.mrb[8].mxu0 }
 0x2f4   :  { %v1748_v63 = vpop.f32.mrb[8].mxu1  ;;  %v1727_v1 = vpop.f32.mrb[9].mxu0 }
 0x2f5   :  { %v1728_v2 = vadd.f32 %v1727_v1, %v1726_v62  ;;  %v1749_v3 = vpop.f32.mrb[9].mxu1  ;;  %v1729_v4 = vpop.f32.mrb[10].mxu0 }
 0x2f6   :  { %v1750_v5 = vadd.f32 %v1749_v3, %v1748_v63  ;;  %v1751_v6 = vpop.f32.mrb[10].mxu1  ;;  %v1730_v7 = vpop.f32.mrb[11].mxu0 }
 0x2f7   :  { %v1496_v8 = vadd.f32 %v1728_v2, %v1677_v0  ;;  %v1752_v9 = vpop.f32.mrb[11].mxu1 }
 0x2f9   :  { %v1536_v10 = vadd.f32 %v1750_v5, %v1496_v8 }
 0x2fb   :  { %2015 = vtanh.f32 %v1536_v10 }
 0x305   :  { %v2016_v12 = vpop.eup %2015 }
 0x306   :  { %1542 = vst [vmem:[%s2615_s7] sm:$0xff] %v2016_v12 }

</bundles_post_ra>
